<compile_context>
chip_gen: v5e
topology: v5e:2x2
jax: 0.10.0
libtpu: 0.0.40
codegen_flags: <defaults>
</compile_context>

<pallas_src>
import numpy as np
import jax
import jax.numpy as jnp
from jax.experimental import pallas as pl
from jax.experimental.pallas import tpu as pltpu


def max_agg_kernel(x_ref, o_ref):
    # x_ref: (TM, Ts, C) block; o_ref: (TM, C) block.
    # Reduce over the Ts axis (sublane reduction) — pure VPU/XLU work.
    o_ref[...] = jnp.max(x_ref[...], axis=1)


def max_aggregate(x, *, max_rows_per_block=512):
    """MAX.forward(x, need_attention_weights=False): max over dim=2.

    x: (B, Tt, Ts, C)  ->  (B, Tt, C)
    """
    B, Tt, Ts, C = x.shape
    n_rows = B * Tt
    xf = x.reshape(n_rows, Ts, C)

    # Rows per grid step: either the whole row axis (single step) or a
    # sublane-aligned (multiple-of-8) block.  A partial last block is handled
    # by Pallas (padded reads, masked writes), which is safe for a per-row max.
    if n_rows <= max_rows_per_block:
        tm = n_rows
    else:
        tm = (max_rows_per_block - (max_rows_per_block % 8)) or 8

    out = pl.pallas_call(
        max_agg_kernel,
        out_shape=jax.ShapeDtypeStruct((n_rows, C), x.dtype),
        grid_spec=pltpu.PrefetchScalarGridSpec(
            num_scalar_prefetch=0,
            grid=(pl.cdiv(n_rows, tm),),
            in_specs=[pl.BlockSpec((tm, Ts, C), lambda i: (i, 0, 0))],
            out_specs=pl.BlockSpec((tm, C), lambda i: (i, 0)),
        ),
        compiler_params=pltpu.CompilerParams(
            dimension_semantics=("parallel",)),
    )(xf)
    return out.reshape(B, Tt, C)


# TODO(synk): the need_attention_weights=True branch (argmax-vote attention
# weights over Ts, normalized per target step) is not implemented as a Pallas
# kernel; the default forward path (returns (max over Ts, None)) is covered.


def max_aggregate_ref(x):
    """Pure-JAX reference mirroring the PyTorch forward (default path)."""
    return jnp.max(x, axis=2)


if __name__ == "__main__":
    key = jax.random.PRNGKey(0)
    B, Tt, Ts, C = 2, 8, 8, 32
    x = jax.random.normal(key, (B, Tt, Ts, C), dtype=jnp.float32)

    out = jax.block_until_ready(max_aggregate(x))
    ref = max_aggregate_ref(x)

    assert out.shape == (B, Tt, C), f"bad output shape {out.shape}"
    assert np.allclose(np.asarray(out), np.asarray(ref)), \
        "Pallas result does not match reference"
    print("KERNEL_OK")
</pallas_src>

<mosaic_0001>
module attributes {stable_mosaic.version = 11 : i64} {
  func.func @max_agg_kernel(%arg0: i32, %arg1: memref<16x8x32xf32, #tpu.memory_space<vmem>>, %arg2: memref<16x32xf32, #tpu.memory_space<vmem>>) attributes {dimension_semantics = [#tpu.dimension_semantics<parallel>], iteration_bounds = array<i64: 1>, scalar_prefetch = 0 : i64, scratch_operands = 0 : i64, tpu.core_type = #tpu.core_type<tc>, window_params = [{transform_indices = @transform_0, window_bounds = array<i64: 16, 8, 32>}, {transform_indices = @transform_1, window_bounds = array<i64: 16, 32>}]} {
    %c0 = arith.constant 0 : index
    %c0_0 = arith.constant 0 : index
    %c0_1 = arith.constant 0 : index
    %0 = vector.load %arg1[%c0, %c0_0, %c0_1] : memref<16x8x32xf32, #tpu.memory_space<vmem>>, vector<16x8x32xf32>
    %cst = arith.constant dense<0xFF800000> : vector<16x32xf32>
    %1 = vector.multi_reduction <maximumf>, %0, %cst [1] : vector<16x8x32xf32> to vector<16x32xf32>
    %c0_2 = arith.constant 0 : index
    %c0_3 = arith.constant 0 : index
    %2 = vector.load %arg2[%c0_2, %c0_3] : memref<16x32xf32, #tpu.memory_space<vmem>>, vector<16x32xf32>
    tpu.vector_store %arg2[%c0_2, %c0_3], %1 {strides = array<i32>} : memref<16x32xf32, #tpu.memory_space<vmem>>, vector<16x32xf32>,
    return
  }
  func.func @transform_0(%arg0: i32) -> (i32, i32, i32) {
    %c0_i32 = arith.constant 0 : i32
    %c0_i32_0 = arith.constant 0 : i32
    %c0_i32_1 = arith.constant 0 : i32
    return %arg0, %c0_i32, %c0_i32_0 : i32, i32, i32
  }
  func.func @transform_1(%arg0: i32) -> (i32, i32) {
    %c0_i32 = arith.constant 0 : i32
    %c0_i32_0 = arith.constant 0 : i32
    return %arg0, %c0_i32 : i32, i32
  }
}

</mosaic_0001>

<bundles_post_ra>
// kernel: tpu_custom_call.1
= control target key start
LH: loop header
LB: loop body
LE: loop exit
PB: predicated region body
PF: predicated region fallthrough
CT: control target
= control target key end

     0   :  { %6 = vsyncpa [#allocation3], 0  ;;  %s328_s0 = inlined_call_operand.hbm [shape: f32[16,8,32], index: 0, kind: input, shape index: {}]   ;;  %s329_s1 = inlined_call_operand.hbm [shape: f32[16,32], index: 1, kind: output, shape index: {}]  }
   0x1   :  { %7 = vsyncpa [#allocation4], 0  ;;  %s12_s8 = sshll.u32 %s328_s0, 4  ;;  %s270_s9 = smov [#allocation2]   ;;  %s13_s8 = int_to_ptr.hbm [resolvable:$true] %s12_s8 }
   0x2   :  { %s14_s10 = sshll.u32 %s270_s9, 4  ;;  %s271_s11 = smov 128   ;;  %s15_s10 = int_to_ptr.vmem [resolvable:$true] %s14_s10 }
   0x3   :  { %s272_s12 = smov 8  }
   0x4   :  { %20 = dma.hbm_to_vmem [thread:$0]  %s13_s8, 2048, %s15_s10, [#allocation3], %s271_s11, %s271_s11, %s272_s12  }
   0x5   :  { %266 = dma.done.wait [#allocation3], 2048  }
   0x6   :  { %267 = vsyncadd [#allocation3], 4294965248  ;;  %vm41_vm0 = vcmask 261120   ;;  %v25_v0 = vld [vmem:[#allocation2] sm:$0xff]  ;;  %v26_v1 = vld [vmem:[#allocation2 + $0x8] sm:$0xff]  ;;  %vm170_vm1 = vcmask 1041409  }
   0x7   :  { %v27_v2 = vld [vmem:[#allocation2 + $0x10] sm:$0xff]  ;;  %v28_v3 = vld [vmem:[#allocation2 + $0x18] sm:$0xff]  ;;  %v29_v4 = vld [vmem:[#allocation2 + $0x20] sm:$0xff]  ;;  %v42_v6 = vsel %vm41_vm0, %v25_v0, -inf  ;;  %v49_v7 = vsel %vm41_vm0, %v26_v1, -inf  ;;  %vm172_vm2 = vcmask 1042434  }
   0x8   :  { %v30_v5 = vld [vmem:[#allocation2 + $0x28] sm:$0xff]  ;;  %v56_v8 = vsel %vm41_vm0, %v27_v2, -inf  ;;  %v31_v9 = vld [vmem:[#allocation2 + $0x30] sm:$0xff]  ;;  %v32_v10 = vld [vmem:[#allocation2 + $0x38] sm:$0xff]  ;;  %v43_v11 = vrot.slane %v42_v6, 4  ;;  %v50_v12 = vrot.slane %v49_v7, 4 }
   0x9   :  { %v57_v13 = vrot.slane %v56_v8, 4  ;;  %v63_v14 = vsel %vm41_vm0, %v28_v3, -inf  ;;  %v70_v16 = vsel %vm41_vm0, %v29_v4, -inf  ;;  %v77_v17 = vsel %vm41_vm0, %v30_v5, -inf  ;;  %v33_v51 = vld [vmem:[#allocation2 + $0x40] sm:$0xff]  ;;  %v34_v52 = vld [vmem:[#allocation2 + $0x48] sm:$0xff] }
   0xa   :  { %v64_v15 = vrot.slane %v63_v14, 4  ;;  %v84_v18 = vsel %vm41_vm0, %v31_v9, -inf  ;;  %v44_v19 = vmax.f32 %v42_v6, %v43_v11  ;;  %v51_v20 = vmax.f32 %v49_v7, %v50_v12  ;;  %v35_v61 = vld [vmem:[#allocation2 + $0x50] sm:$0xff]  ;;  %v36_v0 = vld [vmem:[#allocation2 + $0x58] sm:$0xff]  ;;  %v38_v9 = vld [vmem:[#allocation2 + $0x68] sm:$0xff]  ;;  %s273_s0 = smov [#allocation5]  }
   0xb   :  { %v58_v21 = vmax.f32 %v56_v8, %v57_v13  ;;  %v71_v22 = vrot.slane %v70_v16, 4  ;;  %v78_v24 = vrot.slane %v77_v17, 4  ;;  %v85_v25 = vrot.slane %v84_v18, 4  ;;  %v37_v8 = vld [vmem:[#allocation2 + $0x60] sm:$0xff]  ;;  %s199_s13 = sshll.u32 %s273_s0, 4  ;;  %s201_s16 = sshll.u32 %s329_s1, 4  ;;  %s200_s13 = int_to_ptr.vmem [resolvable:$true] %s199_s13  ;;  %s202_s16 = int_to_ptr.hbm [resolvable:$true] %s201_s16 }
   0xc   :  { %v65_v23 = vmax.f32 %v63_v14, %v64_v15  ;;  %v91_v26 = vsel %vm41_vm0, %v32_v10, -inf  ;;  %vm174_vm3 = vcmask 1043459   ;;  %v45_v27 = vrot.slane %v44_v19, 2 }
   0xd   :  { %v52_v28 = vrot.slane %v51_v20, 2  ;;  %v59_v29 = vrot.slane %v58_v21, 2  ;;  %v72_v30 = vmax.f32 %v70_v16, %v71_v22  ;;  %vm176_vm4 = vcmask 1044484  }
   0xe   :  { %v66_v31 = vrot.slane %v65_v23, 2  ;;  %v79_v32 = vmax.f32 %v77_v17, %v78_v24  ;;  %v86_v33 = vmax.f32 %v84_v18, %v85_v25  ;;  %v92_v34 = vrot.slane %v91_v26, 4  ;;  %v39_v18 = vld [vmem:[#allocation2 + $0x70] sm:$0xff] }
   0xf   :  { %vm178_vm5 = vcmask 1045509   ;;  %v46_v35 = vmax.f32 %v44_v19, %v45_v27  ;;  %v53_v36 = vmax.f32 %v51_v20, %v52_v28  ;;  %v60_v37 = vmax.f32 %v58_v21, %v59_v29  ;;  %v40_v27 = vld [vmem:[#allocation2 + $0x78] sm:$0xff] }
  0x10   :  { %v73_v38 = vrot.slane %v72_v30, 2  ;;  %vm180_vm6 = vcmask 1046534   ;;  %v67_v39 = vmax.f32 %v65_v23, %v66_v31  ;;  %v80_v40 = vrot.slane %v79_v32, 2 }
  0x11   :  { %v87_v41 = vrot.slane %v86_v33, 2  ;;  %v93_v42 = vmax.f32 %v91_v26, %v92_v34  ;;  %vm182_vm7 = vcmask 1047559   ;;  %v47_v43 = vrot.slane %v46_v35, 1 }
  0x12   :  { %v54_v44 = vrot.slane %v53_v36, 1  ;;  %v61_v45 = vrot.slane %v60_v37, 1  ;;  %v74_v46 = vmax.f32 %v72_v30, %v73_v38  ;;  %v68_v47 = vrot.slane %v67_v39, 1 }
  0x13   :  { %v81_v48 = vmax.f32 %v79_v32, %v80_v40  ;;  %v88_v49 = vmax.f32 %v86_v33, %v87_v41  ;;  %v94_v50 = vrot.slane %v93_v42, 2  ;;  %v48_v53 = vmax.f32 %v46_v35, %v47_v43 }
  0x14   :  { %v55_v54 = vmax.f32 %v53_v36, %v54_v44  ;;  %v62_v55 = vmax.f32 %v60_v37, %v61_v45  ;;  %v75_v56 = vrot.slane %v74_v46, 1  ;;  %v69_v57 = vmax.f32 %v67_v39, %v68_v47 }
  0x15   :  { %v82_v58 = vrot.slane %v81_v48, 1  ;;  %v89_v59 = vrot.slane %v88_v49, 1  ;;  %v95_v60 = vmax.f32 %v93_v42, %v94_v50  ;;  %v98_v1 = vsel %vm41_vm0, %v33_v51, -inf }
  0x16   :  { %v76_v62 = vmax.f32 %v74_v46, %v75_v56  ;;  %v171_v63 = vsel %vm170_vm1, %v55_v54, %v48_v53  ;;  %v105_v2 = vsel %vm41_vm0, %v34_v52, -inf  ;;  %v99_v10 = vrot.slane %v98_v1, 4 }
  0x17   :  { %v83_v3 = vmax.f32 %v81_v48, %v82_v58  ;;  %v90_v4 = vmax.f32 %v88_v49, %v89_v59  ;;  %v96_v5 = vrot.slane %v95_v60, 1  ;;  %v173_v6 = vsel %vm172_vm2, %v62_v55, %v171_v63 }
  0x18   :  { %v175_v7 = vsel %vm174_vm3, %v69_v57, %v173_v6  ;;  %v106_v11 = vrot.slane %v105_v2, 4  ;;  %v112_v12 = vsel %vm41_vm0, %v35_v61, -inf  ;;  %v119_v16 = vsel %vm41_vm0, %v36_v0, -inf }
  0x19   :  { %v97_v13 = vmax.f32 %v95_v60, %v96_v5  ;;  %v177_v14 = vsel %vm176_vm4, %v76_v62, %v175_v7  ;;  %v113_v15 = vrot.slane %v112_v12, 4  ;;  %v100_v19 = vmax.f32 %v98_v1, %v99_v10 }
  0x1a   :  { %v179_v17 = vsel %vm178_vm5, %v83_v3, %v177_v14  ;;  %v107_v20 = vmax.f32 %v105_v2, %v106_v11  ;;  %v120_v21 = vrot.slane %v119_v16, 4  ;;  %v126_v24 = vsel %vm41_vm0, %v37_v8, -inf }
  0x1b   :  { %v181_v22 = vsel %vm180_vm6, %v90_v4, %v179_v17  ;;  %v114_v23 = vmax.f32 %v112_v12, %v113_v15  ;;  %v133_v25 = vsel %vm41_vm0, %v38_v9, -inf  ;;  %v101_v28 = vrot.slane %v100_v19, 2 }
  0x1c   :  { %v183_v26 = vsel %vm182_vm7, %v97_v13, %v181_v22  ;;  %v108_v29 = vrot.slane %v107_v20, 2  ;;  %v121_v30 = vmax.f32 %v119_v16, %v120_v21  ;;  %v127_v32 = vrot.slane %v126_v24, 4 }
  0x1d   :  { %193 = vst.msk [vmem:[#allocation5] sm:$0xff] %vm41_vm0, %v183_v26  ;;  %v115_v31 = vrot.slane %v114_v23, 2  ;;  %v134_v33 = vrot.slane %v133_v25, 4  ;;  %v140_v34 = vsel %vm41_vm0, %v39_v18, -inf  ;;  %v102_v35 = vmax.f32 %v100_v19, %v101_v28 }
  0x1e   :  { %v109_v36 = vmax.f32 %v107_v20, %v108_v29  ;;  %v122_v37 = vrot.slane %v121_v30, 2  ;;  %v141_v38 = vrot.slane %v140_v34, 4  ;;  %v128_v40 = vmax.f32 %v126_v24, %v127_v32 }
  0x1f   :  { %v116_v39 = vmax.f32 %v114_v23, %v115_v31  ;;  %v135_v41 = vmax.f32 %v133_v25, %v134_v33  ;;  %v147_v42 = vsel %vm41_vm0, %v40_v27, -inf  ;;  %v103_v43 = vrot.slane %v102_v35, 1 }
  0x20   :  { %v110_v44 = vrot.slane %v109_v36, 1  ;;  %v123_v45 = vmax.f32 %v121_v30, %v122_v37  ;;  %v142_v46 = vmax.f32 %v140_v34, %v141_v38  ;;  %v129_v48 = vrot.slane %v128_v40, 2 }
  0x21   :  { %v117_v47 = vrot.slane %v116_v39, 1  ;;  %v136_v49 = vrot.slane %v135_v41, 2  ;;  %v148_v50 = vrot.slane %v147_v42, 4  ;;  %v104_v51 = vmax.f32 %v102_v35, %v103_v43 }
  0x22   :  { %v111_v52 = vmax.f32 %v109_v36, %v110_v44  ;;  %v124_v53 = vrot.slane %v123_v45, 1  ;;  %v143_v54 = vrot.slane %v142_v46, 2  ;;  %v130_v56 = vmax.f32 %v128_v40, %v129_v48 }
  0x23   :  { %v118_v55 = vmax.f32 %v116_v39, %v117_v47  ;;  %v137_v57 = vmax.f32 %v135_v41, %v136_v49  ;;  %v149_v58 = vmax.f32 %v147_v42, %v148_v50 }
  0x24   :  { %v125_v59 = vmax.f32 %v123_v45, %v124_v53  ;;  %v144_v60 = vmax.f32 %v142_v46, %v143_v54  ;;  %v184_v61 = vsel %vm170_vm1, %v111_v52, %v104_v51  ;;  %v131_v62 = vrot.slane %v130_v56, 1 }
  0x25   :  { %v138_v63 = vrot.slane %v137_v57, 1  ;;  %v150_v0 = vrot.slane %v149_v58, 2  ;;  %v185_v1 = vsel %vm172_vm2, %v118_v55, %v184_v61 }
  0x26   :  { %v145_v2 = vrot.slane %v144_v60, 1  ;;  %v186_v3 = vsel %vm174_vm3, %v125_v59, %v185_v1  ;;  %v132_v4 = vmax.f32 %v130_v56, %v131_v62 }
  0x27   :  { %v139_v5 = vmax.f32 %v137_v57, %v138_v63  ;;  %v151_v6 = vmax.f32 %v149_v58, %v150_v0 }
  0x28   :  { %v146_v7 = vmax.f32 %v144_v60, %v145_v2  ;;  %v187_v9 = vsel %vm176_vm4, %v132_v4, %v186_v3 }
  0x29   :  { %v152_v8 = vrot.slane %v151_v6, 1  ;;  %v188_v10 = vsel %vm178_vm5, %v139_v5, %v187_v9 }
  0x2a   :  { %v189_v12 = vsel %vm180_vm6, %v146_v7, %v188_v10 }
  0x2b   :  { %v153_v11 = vmax.f32 %v151_v6, %v152_v8 }
  0x2d   :  { %v190_v13 = vsel %vm182_vm7, %v153_v11, %v189_v12 }
  0x2e   :  { %194 = vst.msk [vmem:[#allocation5 + $0x8] sm:$0xff] %vm41_vm0, %v190_v13 }
  0x2f   :  { %207 = dma.vmem_to_hbm [thread:$0]  %s200_s13, 256, %s202_s16, [#allocation4], %s271_s11, %s271_s11, %s272_s12  }
  0x30   :  { %268 = dma.done.wait [#allocation4], 256  }
  0x31   :  { %269 = vsyncadd [#allocation4], 4294967040 }
  0x32   :  { %212 = vsyncpa [#allocation3], 1 }
  0x33   :  { %213 = vsyncpa [#allocation4], 1 }

</bundles_post_ra>
